<compile_context>
chip_gen: v6e
topology: v6e:2x2x1
jax: 0.10.0
libtpu: 0.0.40
codegen_flags: <defaults>
</compile_context>

<pallas_src>
import random

import numpy as np
import jax
import jax.numpy as jnp
from jax.experimental import pallas as pl
from jax.experimental.pallas import tpu as pltpu


def _cdiv(a: int, b: int) -> int:
    return -(-a // b)


# ----------------------------------------------------------------------------
# Pallas kernel: B planes -> B resized + padded planes, lane-dense layout.
# ----------------------------------------------------------------------------
def _diversity_kernel(ry_ref, rxt_ref, x_ref, o_ref):
    # ry_ref : (T, H)       bf16 row-interp matrix (pad rows are zero)
    # rxt_ref: (B*W, B*T)   bf16 block-diagonal col-interp matrix (pad cols zero)
    # x_ref  : (1, H, B*W)  B input planes, plane index lives in the lane dim
    # o_ref  : (1, T, B*T)  B output planes, plane p at columns [p*T, (p+1)*T)
    x = x_ref[0].astype(jnp.bfloat16)                                  # (H, B*W)
    z = jnp.dot(ry_ref[...], x, preferred_element_type=jnp.float32)   # (T, B*W)
    out = jnp.dot(z.astype(jnp.bfloat16), rxt_ref[...],
                  preferred_element_type=jnp.float32)                 # (T, B*T)
    o_ref[0] = out.astype(o_ref.dtype)


def _bilinear_resize_matrix(in_size: int, out_size: int) -> np.ndarray:
    """M (out_size, in_size) s.t. y = M @ x is a 1-D bilinear resize with the
    torch/torchvision align_corners=False half-pixel convention (no antialias;
    the layer only upsamples, so antialias would be a no-op anyway)."""
    scale = in_size / out_size
    dst = np.arange(out_size, dtype=np.float64)
    src = (dst + 0.5) * scale - 0.5
    src = np.clip(src, 0.0, in_size - 1)
    i0 = np.floor(src).astype(np.int64)
    i1 = np.minimum(i0 + 1, in_size - 1)
    w1 = src - i0
    w0 = 1.0 - w1
    m = np.zeros((out_size, in_size), dtype=np.float32)
    m[np.arange(out_size), i0] += w0.astype(np.float32)
    m[np.arange(out_size), i1] += w1.astype(np.float32)
    return m


def _choose_plane_batch(nc: int, w: int) -> int:
    """Planes per grid step: aim for a >=128-lane x block, but keep at least
    two grid steps when the plane count allows (v7x has 2 TensorCores)."""
    b = max(1, _cdiv(128, w))
    while b > 1 and _cdiv(nc, b) < 2:
        b //= 2
    return max(1, min(b, nc))


@jax.jit
def _diversity_call(x, ry, rxt_bd):
    """x: (N,C,H,W) f32; ry: (T,H) bf16; rxt_bd: (B*W, B*T) bf16 block-diag."""
    n, c, h, w = x.shape
    nc = n * c
    target = ry.shape[0]
    b = rxt_bd.shape[0] // w
    nblk = _cdiv(nc, b)
    nc_pad = nblk * b

    x_flat = x.reshape(nc, h, w)
    if nc_pad != nc:
        x_flat = jnp.pad(x_flat, ((0, nc_pad - nc), (0, 0), (0, 0)))
    # (nblk, B, H, W) -> (nblk, H, B, W) -> (nblk, H, B*W):
    # plane index ends up in the lane dim => lane-dense kernel loads.
    x_blk = (x_flat.reshape(nblk, b, h, w)
                   .transpose(0, 2, 1, 3)
                   .reshape(nblk, h, b * w))

    # VMEM budget: double-buffered x/out blocks + (once-fetched) constants +
    # matmul temporaries, with generous headroom; clamp so it is valid on
    # v5e (16 MiB default scoped), v6e (32 MiB) and v7x (64 MiB physical).
    est = 2 * 4 * (h * b * w + target * b * target)       # f32 blocks, x2 buf
    est += 2 * 2 * (target * h + (b * w) * (b * target))  # bf16 constants
    est += 4 * (target * b * w + target * b * target)     # intermediates
    vmem_bytes = int(min(max(4 * est, 8 * 2**20), 32 * 2**20))

    out_blk = pl.pallas_call(
        _diversity_kernel,
        out_shape=jax.ShapeDtypeStruct((nblk, target, b * target), x.dtype),
        grid_spec=pltpu.PrefetchScalarGridSpec(
            num_scalar_prefetch=0,
            grid=(nblk,),
            in_specs=[
                pl.BlockSpec((target, h), lambda i: (0, 0)),           # Ry
                pl.BlockSpec((b * w, b * target), lambda i: (0, 0)),   # Rx^T blkdiag
                pl.BlockSpec((1, h, b * w), lambda i: (i, 0, 0)),      # B planes
            ],
            out_specs=pl.BlockSpec((1, target, b * target),
                                   lambda i: (i, 0, 0)),
        ),
        compiler_params=pltpu.CompilerParams(
            dimension_semantics=("parallel",),
            vmem_limit_bytes=vmem_bytes),
    )(ry, rxt_bd, x_blk)

    # (nblk, T, B*T) -> (nblk, B, T, T) -> (N, C, T, T)
    out = (out_blk.reshape(nblk, target, b, target)
                  .transpose(0, 2, 1, 3)
                  .reshape(nc_pad, target, target)[:nc]
                  .reshape(n, c, target, target))
    return out


def _resize_and_pad_pallas(x: jnp.ndarray, target: int, first_resize: int,
                           left: int, top: int) -> jnp.ndarray:
    """x: (N, C, H, W) float32 -> (N, C, target, target) float32."""
    n, c, h, w = x.shape
    assert h == w, "DiversityLayer expects square spatial inputs"
    nc = n * c
    b = _choose_plane_batch(nc, w)

    # Interpolation matrices with the zero pad band embedded (host numpy is
    # tiny: O(target * H) floats; passed as runtime data -> no recompiles).
    my = _bilinear_resize_matrix(h, first_resize)               # (r, H)
    mx = _bilinear_resize_matrix(w, first_resize)               # (r, W)
    ry_pad = np.zeros((target, h), dtype=np.float32)
    ry_pad[top:top + first_resize, :] = my
    rxt_pad = np.zeros((w, target), dtype=np.float32)
    rxt_pad[:, left:left + first_resize] = mx.T
    # Block-diagonal Rx^T so the column resize of all B planes is a single
    # lane-dense (T, B*W) @ (B*W, B*T) matmul.
    rxt_bd = np.zeros((b * w, b * target), dtype=np.float32)
    for p in range(b):
        rxt_bd[p * w:(p + 1) * w, p * target:(p + 1) * target] = rxt_pad

    ry = jnp.asarray(ry_pad, dtype=jnp.bfloat16)
    rxt = jnp.asarray(rxt_bd, dtype=jnp.bfloat16)
    return _diversity_call(x, ry, rxt)


def _resize_and_pad_ref(x, target, first_resize, left, top):
    """Pure-JAX f32 reference with the same interpolation convention."""
    n, c, h, w = x.shape
    my = _bilinear_resize_matrix(h, first_resize)
    mx = _bilinear_resize_matrix(w, first_resize)
    ry = np.zeros((target, h), np.float32)
    ry[top:top + first_resize] = my
    rx = np.zeros((target, w), np.float32)
    rx[left:left + first_resize] = mx
    return jnp.einsum('th,nchw,kw->nctk', jnp.asarray(ry), x, jnp.asarray(rx))


class DiversityLayerPallas:
    """JAX/Pallas port of extorch's DiversityLayer (forward pass)."""

    def __init__(self, target: int, p: float = 0.5,
                 np_seed: int = 1, py_seed: int = 0) -> None:
        self.target = target
        self.p = p
        # Deterministic stand-ins for the module-level np.random / random state.
        self._np_rng = np.random.RandomState(np_seed)
        self._py_rng = random.Random(py_seed)

    def __call__(self, x: jnp.ndarray) -> jnp.ndarray:
        if self._np_rng.rand() < self.p:
            ori_size = x.shape[-1]
            # Python random.randint is inclusive on both ends -- exactly the
            # RNG the reference module uses (it is NOT torch.randint).
            first_resize = self._py_rng.randint(ori_size, self.target - 1)
            up = self._py_rng.randint(0, self.target - first_resize)
            left = self._py_rng.randint(0, self.target - first_resize)
            return _resize_and_pad_pallas(x, self.target, first_resize,
                                          left=left, top=up)
        # NOTE: like the PyTorch module, the two branches have different
        # output shapes ((N,C,H,W) vs (N,C,T,T)).
        return x


if __name__ == "__main__":
    key = jax.random.PRNGKey(0)
    x = jax.random.normal(key, (2, 4, 16, 16), dtype=jnp.float32)

    # 1) Deterministic kernel exercise + correctness check against a pure-JAX
    #    f32 reference (bf16 operands in-kernel -> loose tolerance).
    target, r, left, top = 24, 20, 2, 1
    out = jax.block_until_ready(_resize_and_pad_pallas(x, target, r, left, top))
    ref = jax.block_until_ready(_resize_and_pad_ref(x, target, r, left, top))
    assert out.shape == (2, 4, target, target), out.shape
    assert out.dtype == jnp.float32
    np.testing.assert_allclose(np.asarray(out), np.asarray(ref),
                               atol=5e-2, rtol=5e-2)

    # 2) Full layer with the stochastic branch (matches the module's RNG use).
    layer = DiversityLayerPallas(target=24, p=0.5)
    out2 = jax.block_until_ready(layer(x))
    assert out2.shape in ((2, 4, 16, 16), (2, 4, 24, 24)), out2.shape
    assert out2.dtype == jnp.float32

    print("KERNEL_OK")
</pallas_src>

<mosaic_0001>
module attributes {stable_mosaic.version = 11 : i64} {
  func.func @_diversity_kernel(%arg0: i32, %arg1: memref<24x16xbf16, #tpu.memory_space<vmem>>, %arg2: memref<64x96xbf16, #tpu.memory_space<vmem>>, %arg3: memref<1x16x64xf32, #tpu.memory_space<vmem>>, %arg4: memref<1x24x96xf32, #tpu.memory_space<vmem>>) attributes {dimension_semantics = [#tpu.dimension_semantics<parallel>], iteration_bounds = array<i64: 2>, scalar_prefetch = 0 : i64, scratch_operands = 0 : i64, tpu.core_type = #tpu.core_type<tc>, window_params = [{pipeline_mode = #tpu.pipeline_mode<synchronous>, transform_indices = @transform_0, window_bounds = array<i64: 24, 16>}, {pipeline_mode = #tpu.pipeline_mode<synchronous>, transform_indices = @transform_1, window_bounds = array<i64: 64, 96>}, {transform_indices = @transform_2, window_bounds = array<i64: 1, 16, 64>}, {transform_indices = @transform_3, window_bounds = array<i64: 1, 24, 96>}]} {
    %c0 = arith.constant 0 : index
    %c0_0 = arith.constant 0 : index
    %c0_1 = arith.constant 0 : index
    %0 = vector.load %arg3[%c0, %c0_0, %c0_1] : memref<1x16x64xf32, #tpu.memory_space<vmem>>, vector<1x16x64xf32>
    %1 = vector.shape_cast %0 : vector<1x16x64xf32> to vector<16x64xf32>
    %2 = arith.truncf %1 : vector<16x64xf32> to vector<16x64xbf16>
    %c0_2 = arith.constant 0 : index
    %c0_3 = arith.constant 0 : index
    %3 = vector.load %arg1[%c0_2, %c0_3] : memref<24x16xbf16, #tpu.memory_space<vmem>>, vector<24x16xbf16>
    %cst = arith.constant dense<0.000000e+00> : vector<24x64xf32>
    %4 = tpu.matmul %3, %2, %cst {dimension_numbers = #tpu.dot_dimension_numbers<[1], [0], [0], [1], [0, 0, 1, 1], [], []>} : vector<24x16xbf16>, vector<16x64xbf16>, vector<24x64xf32> -> vector<24x64xf32>
    %5 = arith.truncf %4 : vector<24x64xf32> to vector<24x64xbf16>
    %c0_4 = arith.constant 0 : index
    %c0_5 = arith.constant 0 : index
    %6 = vector.load %arg2[%c0_4, %c0_5] : memref<64x96xbf16, #tpu.memory_space<vmem>>, vector<64x96xbf16>
    %cst_6 = arith.constant dense<0.000000e+00> : vector<24x96xf32>
    %7 = tpu.matmul %5, %6, %cst_6 {dimension_numbers = #tpu.dot_dimension_numbers<[1], [0], [0], [1], [0, 0, 1, 1], [], []>} : vector<24x64xbf16>, vector<64x96xbf16>, vector<24x96xf32> -> vector<24x96xf32>
    %c0_7 = arith.constant 0 : index
    %c0_8 = arith.constant 0 : index
    %c0_9 = arith.constant 0 : index
    %8 = vector.load %arg4[%c0_7, %c0_8, %c0_9] : memref<1x24x96xf32, #tpu.memory_space<vmem>>, vector<1x24x96xf32>
    %9 = vector.shape_cast %8 : vector<1x24x96xf32> to vector<24x96xf32>
    %10 = vector.shape_cast %7 : vector<24x96xf32> to vector<1x24x96xf32>
    tpu.vector_store %arg4[%c0_7, %c0_8, %c0_9], %10 {strides = array<i32>} : memref<1x24x96xf32, #tpu.memory_space<vmem>>, vector<1x24x96xf32>,
    return
  }
  func.func @transform_0(%arg0: i32) -> (i32, i32) {
    %c0_i32 = arith.constant 0 : i32
    %c0_i32_0 = arith.constant 0 : i32
    %c0_i32_1 = arith.constant 0 : i32
    return %c0_i32, %c0_i32_0 : i32, i32
  }
  func.func @transform_1(%arg0: i32) -> (i32, i32) {
    %c0_i32 = arith.constant 0 : i32
    %c0_i32_0 = arith.constant 0 : i32
    %c0_i32_1 = arith.constant 0 : i32
    return %c0_i32, %c0_i32_0 : i32, i32
  }
  func.func @transform_2(%arg0: i32) -> (i32, i32, i32) {
    %c0_i32 = arith.constant 0 : i32
    %c0_i32_0 = arith.constant 0 : i32
    %c0_i32_1 = arith.constant 0 : i32
    return %arg0, %c0_i32, %c0_i32_0 : i32, i32, i32
  }
  func.func @transform_3(%arg0: i32) -> (i32, i32, i32) {
    %c0_i32 = arith.constant 0 : i32
    %c0_i32_0 = arith.constant 0 : i32
    %c0_i32_1 = arith.constant 0 : i32
    return %arg0, %c0_i32, %c0_i32_0 : i32, i32, i32
  }
}

</mosaic_0001>

<bundles_post_ra>
// kernel: _diversity_call.1
= control target key start
LH: loop header
LB: loop body
LE: loop exit
PB: predicated region body
PF: predicated region fallthrough
CT: control target
= control target key end

     0   :  { %s480_s12 = smov 0   ;;  %s521_s0 = inlined_call_operand.vmem [shape: bf16[24,16], index: 0, kind: input, shape index: {}]   ;;  %s522_s1 = inlined_call_operand.vmem [shape: bf16[64,96], index: 1, kind: input, shape index: {}]   ;;  %s523_s2 = inlined_call_operand.vmem [shape: f32[2,16,64], index: 2, kind: input, shape index: {}]   ;;  %s524_s3 = inlined_call_operand.vmem [shape: f32[2,24,96], index: 3, kind: output, shape index: {}]  }
   0x1 LB: > { %s389_s13 = sadd.s32 4294967295, %s458_s12   ;;  %p393_p0 = scmp.ge.s32.totalorder %s458_s12, 1  ;;  %s458_s12 = sphi %s480_s12, %s13_s12  }
   0x2   : > { %p137_p1 = scmp.lt.s32.totalorder %s458_s12, 3 }
   0x4   : > { %p138_p2 = pnand %p393_p0, %p137_p1 }
   0x5   : > { %p161_p3 = scmp.lt.s32.totalorder (!%p138_p2), %s389_s13, 1 }
   0x6   : > { %141 = sbr.rel (%p138_p2) target bundleno = 423 (0x1a7), region = 32 }
   0xb   : > { %v446_v0 = vld [vmem:[%s521_s0] sm:$0xff]   ;;  %vm186_vm0 = vcmask 130048   ;;  %v448_v1 = vld [vmem:[%s522_s1 + $0x18] sm:$0xff]   ;;  %s526_s13 = smov (!%p161_p3, %s389_s13), 1  ;;  %v449_v2 = vld [vmem:[%s522_s1 + $0x10] sm:$0xff]   ;;  %vm275_vm1 = vcmask 523264  }
   0xc   : > { %421 = vmatprep.mubr.msk.bf16.mxu0 %vm186_vm0, %v446_v0  ;;  %425 = vmatprep.subr.bf16.mxu1 %v448_v1  ;;  %s409_s20 = sshll.u32 %s526_s13, 4  ;;  %v447_v6 = vld [vmem:[%s521_s0 + $0x8] ss:$0 sps:$4 sm:$0xff]   ;;  %v451_v8 = vld [vmem:[%s522_s1] sm:$0xff]   ;;  %s437_s30 = smul.u32 24, %s526_s13  ;;  %vm330_vm2 = vcmask 785408  }
   0xd   : > { %426 = vmatpush3.bf16.msra.mxu1 %v448_v1  ;;  %s165_s23 = scalar_lea.vmem %s523_s2, %s409_s20  ;;  %v450_v7 = vld [vmem:[%s522_s1 + $0x8] sm:$0xff]  }
   0xe   : > { %427 = vmatprep.subr.bf16.mxu1 %v449_v2  ;;  %v172_v3 = vld [vmem:[%s165_s23] sm:$0xff]  ;;  %v173_v4 = vld [vmem:[%s165_s23 + $0x8] sm:$0xff]  ;;  %s170_s6 = scalar_lea.vmem %s524_s3, %s437_s30 }
   0xf   : > { %v174_v5 = vpack.c.bf16 %v173_v4, %v172_v3 }
  0x11   : > { %428 = vmatpush3.bf16.msra.mxu1 %v449_v2  ;;  %419 = vmatprep.subr.bf16.mxu0 %v174_v5 }
  0x12   : > { %420 = vmatpush3.bf16.msra.mxu0 %v174_v5  ;;  %429 = vmatprep.subr.bf16.mxu1 %v450_v7 }
  0x15   : > { %422 = vmatmul.mubr.msk.bf16.vlgmr.msra.gmra.mxu0 %vm186_vm0, %v447_v6  ;;  %430 = vmatpush3.bf16.msra.mxu1 %v450_v7 }
  0x16   : > { %431 = vmatprep.subr.bf16.mxu1 %v451_v8 }
  0x19   : > { %432 = vmatpush3.bf16.msra.mxu1 %v451_v8 }
  0xd5   : > { %v423_v9 = vpop.f32.mrf.mxu0 }
  0xd6   : > { %v242_v14 = vpack.c.bf16 %v423_v9, %v423_v9 }
  0xd7   : > { %v227_v10 = vpop.f32.mrf.mxu0 }
  0xd9   : > { %v424_v11 = vpop.f32.mrf.mxu0 }
  0xdb   : > { %v230_v12 = vpop.f32.mrf.mxu0 }
  0xdc   : > { %v241_v13 = vpack.c.bf16 %v230_v12, %v227_v10 }
  0xde   : > { %433 = vmatprep.mubr.msk.bf16.mxu1 %vm275_vm1, %v241_v13 }
  0xdf   : > { %434 = vmatmul.mubr.msk.bf16.vlgmr.msra.gmra.mxu1 %vm275_vm1, %v242_v14 }
 0x19f   : > { %v435_v15 = vpop.f32.mrf.mxu1 }
 0x1a0   : > { %333 = vst.msk [vmem:[%s170_s6 + $0x10] sm:$0xff] %vm330_vm2, %v435_v15 }
 0x1a1   : > { %v316_v16 = vpop.f32.mrf.mxu1 }
 0x1a2   : > { %331 = vst.msk [vmem:[%s170_s6] sm:$0xff] %vm330_vm2, %v316_v16 }
 0x1a3   : > { %v436_v17 = vpop.f32.mrf.mxu1 }
 0x1a5   : > { %v319_v18 = vpop.f32.mrf.mxu1 }
 0x1a6   : > { %332 = vst.msk [vmem:[%s170_s6 + $0x8] sm:$0xff] %vm330_vm2, %v319_v18 }
 0x1a7 PF: > { %s13_s12 = sadd.s32 1, %s458_s12  }
 0x1a8   : > { %p10_p4 = scmp.ge.s32.totalorder %s13_s12, 4  }
 0x1aa   :  { %12 = sbr.rel (!%p10_p4) target bundleno = 1 (0x1), region = 62 }

</bundles_post_ra>
